<compile_context>
chip_gen: v5e
topology: v5e:2x2
jax: 0.10.0
libtpu: 0.0.40
codegen_flags: <defaults>
</compile_context>

<pallas_src>
import jax
import jax.numpy as jnp
from jax import lax
from jax.experimental import pallas as pl
from jax.experimental.pallas import tpu as pltpu

N_EMBD = 32          # config.n_embd
HIDDEN = 4 * N_EMBD  # 4 * n_embd

_INV_SQRT2 = 0.7071067811865476


def _gelu_exact_f32(x):
    # F.gelu default: 0.5 * x * (1 + erf(x / sqrt(2))), evaluated in f32.
    return 0.5 * x * (1.0 + lax.erf(x * _INV_SQRT2))


def _round_up(a, b):
    return (a + b - 1) // b * b


def mlp_kernel(x_ref, a_ref, b_ref, o_ref):
    # x_ref: (tm//pack, pack*D)  lane-dense packed activation tile (compute dtype)
    # a_ref: (pack*D, pack*H)    block-diagonal kron(I_pack, W_fc^T)
    # b_ref: (pack*H, pack*D)    block-diagonal kron(I_pack, W_proj^T)
    # o_ref: (tm//pack, pack*D)  lane-dense packed output tile
    h = jnp.dot(x_ref[...], a_ref[...], preferred_element_type=jnp.float32)
    g = _gelu_exact_f32(h)                                   # GELU stays in f32
    y = jnp.dot(g.astype(b_ref.dtype), b_ref[...],
                preferred_element_type=jnp.float32)
    o_ref[...] = y.astype(o_ref.dtype)


def mlp_forward(x, w_fc, w_proj, *, tm=1024, compute_dtype=jnp.bfloat16):
    """x: (B, T, D); w_fc: (4D, D); w_proj: (D, 4D)  (PyTorch nn.Linear layout)."""
    B, T, D = x.shape
    H = w_fc.shape[0]
    assert w_fc.shape == (H, D) and w_proj.shape == (D, H)

    M = B * T
    # Pack `pack` logical rows of width D into one 128-wide lane-dense row.
    pack = 128 // D if (D <= 128 and 128 % D == 0) else 1
    align = 8 * pack                      # sublane alignment in packed rows
    tm = _round_up(max(align, min(tm, _round_up(M, align))), align)
    M_pad = _round_up(M, tm)

    x2d = x.reshape(M, D)
    if M_pad != M:
        x2d = jnp.pad(x2d, ((0, M_pad - M), (0, 0)))
    x_dense = x2d.reshape(M_pad // pack, pack * D).astype(compute_dtype)

    # Block-diagonal weights so the packed layout needs no in-kernel reshape.
    eye = jnp.eye(pack, dtype=w_fc.dtype)
    a_blk = jnp.kron(eye, w_fc.T).astype(compute_dtype)      # (pack*D, pack*H)
    b_blk = jnp.kron(eye, w_proj.T).astype(compute_dtype)    # (pack*H, pack*D)

    cbytes = jnp.dtype(compute_dtype).itemsize
    obytes = jnp.dtype(x.dtype).itemsize
    cost = pl.CostEstimate(
        flops=int(4 * M_pad * D * H),                 # two matmuls
        transcendentals=int(M_pad * H),               # erf per hidden element
        bytes_accessed=int(M_pad * D * (cbytes + obytes)
                           + (a_blk.size + b_blk.size) * cbytes),
    )

    out_dense = pl.pallas_call(
        mlp_kernel,
        out_shape=jax.ShapeDtypeStruct((M_pad // pack, pack * D), x.dtype),
        grid_spec=pltpu.PrefetchScalarGridSpec(
            num_scalar_prefetch=0,
            grid=(M_pad // tm,),
            in_specs=[
                pl.BlockSpec((tm // pack, pack * D), lambda i: (i, 0)),  # x tile
                pl.BlockSpec((pack * D, pack * H), lambda i: (0, 0)),    # fc weight
                pl.BlockSpec((pack * H, pack * D), lambda i: (0, 0)),    # proj weight
            ],
            out_specs=pl.BlockSpec((tm // pack, pack * D), lambda i: (i, 0)),
        ),
        compiler_params=pltpu.CompilerParams(
            dimension_semantics=("parallel",)),
        cost_estimate=cost,
    )(x_dense, a_blk, b_blk)

    out2d = out_dense.reshape(M_pad, D)[:M, :]
    return out2d.reshape(B, T, D)


if __name__ == "__main__":
    key = jax.random.PRNGKey(0)
    kx, kfc, kproj = jax.random.split(key, 3)

    B, T, D = 2, 8, N_EMBD
    H = HIDDEN
    x = jax.random.normal(kx, (B, T, D), dtype=jnp.float32)

    # Deterministic synthetic params, PyTorch nn.Linear shapes (out_features, in_features)
    w_fc = jax.random.normal(kfc, (H, D), dtype=jnp.float32) * 0.02
    w_proj = jax.random.normal(kproj, (D, H), dtype=jnp.float32) * 0.02

    out = mlp_forward(x, w_fc, w_proj)
    out = jax.block_until_ready(out)

    # Reference with the same bf16 operand rounding / f32 accumulation as the kernel.
    cd = jnp.bfloat16
    xb = x.reshape(-1, D).astype(cd)
    h_ref = jnp.dot(xb, w_fc.T.astype(cd), preferred_element_type=jnp.float32)
    g_ref = _gelu_exact_f32(h_ref)
    y_ref = jnp.dot(g_ref.astype(cd), w_proj.T.astype(cd),
                    preferred_element_type=jnp.float32)
    ref = y_ref.reshape(B, T, D).astype(x.dtype)

    assert jnp.allclose(out, ref, atol=5e-4, rtol=5e-3), (
        float(jnp.max(jnp.abs(out - ref))))

    print("KERNEL_OK")
</pallas_src>

<mosaic_0001>
module attributes {stable_mosaic.version = 11 : i64} {
  func.func @mlp_kernel(%arg0: i32, %arg1: memref<8x128xbf16, #tpu.memory_space<vmem>>, %arg2: memref<128x512xbf16, #tpu.memory_space<vmem>>, %arg3: memref<512x128xbf16, #tpu.memory_space<vmem>>, %arg4: memref<8x128xf32, #tpu.memory_space<vmem>>) attributes {dimension_semantics = [#tpu.dimension_semantics<parallel>], iteration_bounds = array<i64: 1>, scalar_prefetch = 0 : i64, scratch_operands = 0 : i64, tpu.core_type = #tpu.core_type<tc>, window_params = [{transform_indices = @transform_0, window_bounds = array<i64: 8, 128>}, {pipeline_mode = #tpu.pipeline_mode<synchronous>, transform_indices = @transform_1, window_bounds = array<i64: 128, 512>}, {pipeline_mode = #tpu.pipeline_mode<synchronous>, transform_indices = @transform_2, window_bounds = array<i64: 512, 128>}, {transform_indices = @transform_3, window_bounds = array<i64: 8, 128>}]} {
    %c0 = arith.constant 0 : index
    %c0_0 = arith.constant 0 : index
    %0 = vector.load %arg1[%c0, %c0_0] : memref<8x128xbf16, #tpu.memory_space<vmem>>, vector<8x128xbf16>
    %c0_1 = arith.constant 0 : index
    %c0_2 = arith.constant 0 : index
    %1 = vector.load %arg2[%c0_1, %c0_2] : memref<128x512xbf16, #tpu.memory_space<vmem>>, vector<128x512xbf16>
    %cst = arith.constant dense<0.000000e+00> : vector<8x512xf32>
    %2 = tpu.matmul %0, %1, %cst {dimension_numbers = #tpu.dot_dimension_numbers<[1], [0], [0], [1], [0, 0, 1, 1], [], []>} : vector<8x128xbf16>, vector<128x512xbf16>, vector<8x512xf32> -> vector<8x512xf32>
    %cst_3 = arith.constant 5.000000e-01 : f32
    %3 = vector.broadcast %cst_3 : f32 to vector<8x512xf32>
    %4 = arith.mulf %3, %2 : vector<8x512xf32>
    %cst_4 = arith.constant 0.707106769 : f32
    %5 = vector.broadcast %cst_4 : f32 to vector<8x512xf32>
    %6 = arith.mulf %2, %5 : vector<8x512xf32>
    %7 = math.erf %6 : vector<8x512xf32>
    %cst_5 = arith.constant 1.000000e+00 : f32
    %8 = vector.broadcast %cst_5 : f32 to vector<8x512xf32>
    %9 = arith.addf %8, %7 : vector<8x512xf32>
    %10 = arith.mulf %4, %9 : vector<8x512xf32>
    %11 = arith.truncf %10 : vector<8x512xf32> to vector<8x512xbf16>
    %c0_6 = arith.constant 0 : index
    %c0_7 = arith.constant 0 : index
    %12 = vector.load %arg3[%c0_6, %c0_7] : memref<512x128xbf16, #tpu.memory_space<vmem>>, vector<512x128xbf16>
    %cst_8 = arith.constant dense<0.000000e+00> : vector<8x128xf32>
    %13 = tpu.matmul %11, %12, %cst_8 {dimension_numbers = #tpu.dot_dimension_numbers<[1], [0], [0], [1], [0, 0, 1, 1], [], []>} : vector<8x512xbf16>, vector<512x128xbf16>, vector<8x128xf32> -> vector<8x128xf32>
    %c0_9 = arith.constant 0 : index
    %c0_10 = arith.constant 0 : index
    %14 = vector.load %arg4[%c0_9, %c0_10] : memref<8x128xf32, #tpu.memory_space<vmem>>, vector<8x128xf32>
    tpu.vector_store %arg4[%c0_9, %c0_10], %13 {strides = array<i32>} : memref<8x128xf32, #tpu.memory_space<vmem>>, vector<8x128xf32>,
    return
  }
  func.func @transform_0(%arg0: i32) -> (i32, i32) {
    %c0_i32 = arith.constant 0 : i32
    %c0_i32_0 = arith.constant 0 : i32
    return %arg0, %c0_i32 : i32, i32
  }
  func.func @transform_1(%arg0: i32) -> (i32, i32) {
    %c0_i32 = arith.constant 0 : i32
    %c0_i32_0 = arith.constant 0 : i32
    %c0_i32_1 = arith.constant 0 : i32
    return %c0_i32, %c0_i32_0 : i32, i32
  }
  func.func @transform_2(%arg0: i32) -> (i32, i32) {
    %c0_i32 = arith.constant 0 : i32
    %c0_i32_0 = arith.constant 0 : i32
    %c0_i32_1 = arith.constant 0 : i32
    return %c0_i32, %c0_i32_0 : i32, i32
  }
  func.func @transform_3(%arg0: i32) -> (i32, i32) {
    %c0_i32 = arith.constant 0 : i32
    %c0_i32_0 = arith.constant 0 : i32
    return %arg0, %c0_i32 : i32, i32
  }
}

</mosaic_0001>

<bundles_post_ra>
// kernel: tpu_custom_call.1
= control target key start
LH: loop header
LB: loop body
LE: loop exit
PB: predicated region body
PF: predicated region fallthrough
CT: control target
= control target key end

     0   :  { %8 = vsyncpa [#allocation3], 0  ;;  %s1400_s0 = inlined_call_operand.hbm [shape: bf16[8,128], index: 0, kind: input, shape index: {}]   ;;  %s1401_s1 = inlined_call_operand.hbm [shape: bf16[128,512], index: 1, kind: input, shape index: {}]   ;;  %s1402_s2 = inlined_call_operand.hbm [shape: bf16[512,128], index: 2, kind: input, shape index: {}]   ;;  %s1403_s3 = inlined_call_operand.hbm [shape: f32[8,128], index: 3, kind: output, shape index: {}]  }
   0x1   :  { %9 = vsyncpa [#allocation6], 0  ;;  %s26_s14 = sshll.u32 %s1401_s1, 4  ;;  %s27_s14 = int_to_ptr.hbm [resolvable:$true] %s26_s14 }
   0x2   :  { %10 = vsyncpa [#allocation4], 0  ;;  %s1254_s15 = smov [#allocation5]   ;;  %s16_s19 = sshll.u32 %s1400_s0, 4  ;;  %s17_s19 = int_to_ptr.hbm [resolvable:$true] %s16_s19 }
   0x3   :  { %s28_s16 = sshll.u32 %s1254_s15, 4  ;;  %s1255_s20 = smov 256   ;;  %s29_s16 = int_to_ptr.vmem [resolvable:$true] %s28_s16 }
   0x4   :  { %s1256_s21 = smov 16   ;;  %s1257_s22 = smov [#allocation2]  }
   0x5   :  { %34 = dma.hbm_to_vmem [thread:$0]  %s27_s14, 4096, %s29_s16, [#allocation6], %s1255_s20, %s1255_s20, %s1256_s21  }
   0x6   :  { %s18_s23 = sshll.u32 %s1257_s22, 4  ;;  %s39_s26 = sshll.u32 %s1402_s2, 4  ;;  %s19_s23 = int_to_ptr.vmem [resolvable:$true] %s18_s23  ;;  %s40_s26 = int_to_ptr.hbm [resolvable:$true] %s39_s26 }
   0x7   :  { %21 = dma.hbm_to_vmem [thread:$0]  %s17_s19, 64, %s19_s23, [#allocation3]  }
   0x8   :  { %s1258_s1 = smov [#allocation7]   ;;  %s1259_s28 = smov 64  }
   0x9   :  { %s41_s27 = sshll.u32 %s1258_s1, 4  ;;  %s1260_s29 = smov 4   ;;  %s42_s27 = int_to_ptr.vmem [resolvable:$true] %s41_s27 }
   0xa   :  { %47 = dma.hbm_to_vmem [thread:$0]  %s40_s26, 4096, %s42_s27, [#allocation6], %s1259_s28, %s1259_s28, %s1260_s29  }
   0xb   :  { %1248 = dma.done.wait [#allocation3], 64  }
   0xc   :  { %1249 = vsyncadd [#allocation3], 4294967232 }
   0xd   :  { %1250 = dma.done.wait [#allocation6], 8192  }
   0xe   :  { %1251 = vsyncadd [#allocation6], 4294959104  ;;  %v926_v0 = vld [vmem:[#allocation5 + $0xe0] sm:$0xf]  ;;  %v1102_v1 = vld [vmem:[#allocation5 + $0xec] sm:$0xf0] }
   0xf   :  { %v1100_v2 = vld [vmem:[#allocation5 + $0xe4] sm:$0xf]  ;;  %v927_v3 = vor.u32 %v1102_v1, %v926_v0  ;;  %v928_v4 = vld [vmem:[#allocation5 + $0xf0] sm:$0xf0]  ;;  %v934_v5 = vld [vmem:[#allocation5 + $0xe8] sm:$0xf] }
  0x10   :  { %v1103_v6 = vld [vmem:[#allocation5 + $0xf4] sm:$0xf0]  ;;  %v931_v7 = vor.u32 %v1100_v2, %v928_v4  ;;  %v1101_v9 = vld [vmem:[#allocation5 + $0xec] sm:$0xf]  ;;  %v936_v10 = vld [vmem:[#allocation5 + $0xf8] sm:$0xf0] }
  0x11   :  { %v935_v8 = vor.u32 %v1103_v6, %v934_v5  ;;  %v910_v11 = vld [vmem:[#allocation5 + $0xc0] sm:$0xf]  ;;  %253 = vmatpush.bf16.msra.mxu0 %v927_v3  ;;  %v939_v12 = vor.u32 %v1101_v9, %v936_v10  ;;  %v1098_v13 = vld [vmem:[#allocation5 + $0xcc] sm:$0xf0]  ;;  %v1096_v14 = vld [vmem:[#allocation5 + $0xc4] sm:$0xf] }
  0x12   :  { %v912_v15 = vld [vmem:[#allocation5 + $0xd0] sm:$0xf0]  ;;  %266 = vmatpush.bf16.msra.mxu1 %v931_v7  ;;  %v911_v16 = vor.u32 %v1098_v13, %v910_v11  ;;  %v918_v18 = vld [vmem:[#allocation5 + $0xc8] sm:$0xf]  ;;  %v1099_v19 = vld [vmem:[#allocation5 + $0xd4] sm:$0xf0] }
  0x13   :  { %279 = vmatpush.bf16.msra.mxu2 %v935_v8  ;;  %v915_v17 = vor.u32 %v1096_v14, %v912_v15  ;;  %v1097_v20 = vld [vmem:[#allocation5 + $0xcc] sm:$0xf]  ;;  %292 = vmatpush.bf16.msra.mxu3 %v939_v12  ;;  %v919_v21 = vor.u32 %v1099_v19, %v918_v18  ;;  %v920_v22 = vld [vmem:[#allocation5 + $0xd8] sm:$0xf0]  ;;  %v894_v23 = vld [vmem:[#allocation5 + $0xa0] sm:$0xf] }
  0x14   :  { %v1094_v24 = vld [vmem:[#allocation5 + $0xac] sm:$0xf0]  ;;  %v923_v25 = vor.u32 %v1097_v20, %v920_v22  ;;  %v1092_v26 = vld [vmem:[#allocation5 + $0xa4] sm:$0xf]  ;;  %v896_v27 = vld [vmem:[#allocation5 + $0xb0] sm:$0xf0] }
  0x15   :  { %v902_v28 = vld [vmem:[#allocation5 + $0xa8] sm:$0xf]  ;;  %254 = vmatpush.bf16.msra.mxu0 %v911_v16  ;;  %v895_v29 = vor.u32 %v1094_v24, %v894_v23  ;;  %v1095_v30 = vld [vmem:[#allocation5 + $0xb4] sm:$0xf0]  ;;  %v1093_v31 = vld [vmem:[#allocation5 + $0xac] sm:$0xf]  ;;  %v899_v33 = vor.u32 %v1092_v26, %v896_v27 }
  0x16   :  { %v904_v32 = vld [vmem:[#allocation5 + $0xb8] sm:$0xf0]  ;;  %267 = vmatpush.bf16.msra.mxu1 %v915_v17  ;;  %v903_v34 = vor.u32 %v1095_v30, %v902_v28  ;;  %v878_v35 = vld [vmem:[#allocation5 + $0x80] sm:$0xf]  ;;  %v1090_v36 = vld [vmem:[#allocation5 + $0x8c] sm:$0xf0] }
  0x17   :  { %280 = vmatpush.bf16.msra.mxu2 %v919_v21  ;;  %v1088_v37 = vld [vmem:[#allocation5 + $0x84] sm:$0xf]  ;;  %293 = vmatpush.bf16.msra.mxu3 %v923_v25  ;;  %v907_v38 = vor.u32 %v1093_v31, %v904_v32  ;;  %v880_v39 = vld [vmem:[#allocation5 + $0x90] sm:$0xf0]  ;;  %v886_v40 = vld [vmem:[#allocation5 + $0x88] sm:$0xf]  ;;  %v879_v44 = vor.u32 %v1090_v36, %v878_v35 }
  0x18   :  { %v1091_v41 = vld [vmem:[#allocation5 + $0x94] sm:$0xf0]  ;;  %v1089_v42 = vld [vmem:[#allocation5 + $0x8c] sm:$0xf]  ;;  %v888_v43 = vld [vmem:[#allocation5 + $0x98] sm:$0xf0]  ;;  %v883_v45 = vor.u32 %v1088_v37, %v880_v39 }
  0x19   :  { %255 = vmatpush.bf16.msra.mxu0 %v895_v29  ;;  %v887_v46 = vor.u32 %v1091_v41, %v886_v40  ;;  %v862_v47 = vld [vmem:[#allocation5 + $0x60] sm:$0xf]  ;;  %v1086_v48 = vld [vmem:[#allocation5 + $0x6c] sm:$0xf0]  ;;  %v1084_v49 = vld [vmem:[#allocation5 + $0x64] sm:$0xf]  ;;  %v891_v50 = vor.u32 %v1089_v42, %v888_v43 }
  0x1a   :  { %268 = vmatpush.bf16.msra.mxu1 %v899_v33  ;;  %v864_v51 = vld [vmem:[#allocation5 + $0x70] sm:$0xf0]  ;;  %v870_v52 = vld [vmem:[#allocation5 + $0x68] sm:$0xf]  ;;  %v1087_v53 = vld [vmem:[#allocation5 + $0x74] sm:$0xf0]  ;;  %v863_v56 = vor.u32 %v1086_v48, %v862_v47 }
  0x1b   :  { %281 = vmatpush.bf16.msra.mxu2 %v903_v34  ;;  %294 = vmatpush.bf16.msra.mxu3 %v907_v38  ;;  %v1085_v54 = vld [vmem:[#allocation5 + $0x6c] sm:$0xf]  ;;  %v872_v55 = vld [vmem:[#allocation5 + $0x78] sm:$0xf0]  ;;  %v867_v57 = vor.u32 %v1084_v49, %v864_v51  ;;  %v871_v58 = vor.u32 %v1087_v53, %v870_v52  ;;  %v846_v59 = vld [vmem:[#allocation5 + $0x40] sm:$0xf] }
  0x1c   :  { %v1082_v60 = vld [vmem:[#allocation5 + $0x4c] sm:$0xf0]  ;;  %v1080_v61 = vld [vmem:[#allocation5 + $0x44] sm:$0xf]  ;;  %v875_v62 = vor.u32 %v1085_v54, %v872_v55  ;;  %v848_v63 = vld [vmem:[#allocation5 + $0x50] sm:$0xf0] }
  0x1d   :  { %256 = vmatpush.bf16.msra.mxu0 %v879_v44  ;;  %v854_v0 = vld [vmem:[#allocation5 + $0x48] sm:$0xf]  ;;  %v1083_v1 = vld [vmem:[#allocation5 + $0x54] sm:$0xf0]  ;;  %v1081_v2 = vld [vmem:[#allocation5 + $0x4c] sm:$0xf]  ;;  %v847_v4 = vor.u32 %v1082_v60, %v846_v59  ;;  %v851_v5 = vor.u32 %v1080_v61, %v848_v63 }
  0x1e   :  { %269 = vmatpush.bf16.msra.mxu1 %v883_v45  ;;  %v856_v3 = vld [vmem:[#allocation5 + $0x58] sm:$0xf0]  ;;  %v855_v6 = vor.u32 %v1083_v1, %v854_v0  ;;  %v830_v7 = vld [vmem:[#allocation5 + $0x20] sm:$0xf]  ;;  %v1078_v8 = vld [vmem:[#allocation5 + $0x2c] sm:$0xf0] }
  0x1f   :  { %282 = vmatpush.bf16.msra.mxu2 %v887_v46  ;;  %295 = vmatpush.bf16.msra.mxu3 %v891_v50  ;;  %v1076_v9 = vld [vmem:[#allocation5 + $0x24] sm:$0xf]  ;;  %v859_v10 = vor.u32 %v1081_v2, %v856_v3  ;;  %v832_v11 = vld [vmem:[#allocation5 + $0x30] sm:$0xf0]  ;;  %v838_v12 = vld [vmem:[#allocation5 + $0x28] sm:$0xf]  ;;  %v831_v16 = vor.u32 %v1078_v8, %v830_v7 }
  0x20   :  { %v1079_v13 = vld [vmem:[#allocation5 + $0x34] sm:$0xf0]  ;;  %v1077_v14 = vld [vmem:[#allocation5 + $0x2c] sm:$0xf]  ;;  %v840_v15 = vld [vmem:[#allocation5 + $0x38] sm:$0xf0]  ;;  %v835_v17 = vor.u32 %v1076_v9, %v832_v11 }
  0x21   :  { %257 = vmatpush.bf16.msra.mxu0 %v863_v56  ;;  %v839_v18 = vor.u32 %v1079_v13, %v838_v12  ;;  %v814_v19 = vld [vmem:[#allocation5] sm:$0xf]  ;;  %v1074_v20 = vld [vmem:[#allocation5 + $0xc] sm:$0xf0]  ;;  %v1072_v21 = vld [vmem:[#allocation5 + $0x4] sm:$0xf]  ;;  %v843_v22 = vor.u32 %v1077_v14, %v840_v15 }
  0x22   :  { %270 = vmatpush.bf16.msra.mxu1 %v867_v57  ;;  %v816_v23 = vld [vmem:[#allocation5 + $0x10] sm:$0xf0]  ;;  %v822_v24 = vld [vmem:[#allocation5 + $0x8] sm:$0xf]  ;;  %v1075_v25 = vld [vmem:[#allocation5 + $0x14] sm:$0xf0]  ;;  %v815_v28 = vor.u32 %v1074_v20, %v814_v19 }
  0x23   :  { %283 = vmatpush.bf16.msra.mxu2 %v871_v58  ;;  %296 = vmatpush.bf16.msra.mxu3 %v875_v62  ;;  %v1073_v26 = vld [vmem:[#allocation5 + $0xc] sm:$0xf]  ;;  %v824_v27 = vld [vmem:[#allocation5 + $0x18] sm:$0xf0]  ;;  %v819_v29 = vor.u32 %v1072_v21, %v816_v23  ;;  %v823_v30 = vor.u32 %v1075_v25, %v822_v24  ;;  %v1110_v46 = vld [vmem:[#allocation7 + $0x30] sm:$0xff]  ;;  %s1261_s0 = smov [#allocation8]  }
  0x24   :  { %v827_v31 = vor.u32 %v1073_v26, %v824_v27  ;;  %v60_v32 = vld [vmem:[#allocation2] sm:$0xf]  ;;  %v1118_v47 = vld [vmem:[#allocation7 + $0x70] sm:$0xff]  ;;  %v1109_v0 = vld [vmem:[#allocation7 + $0x28] sm:$0xff]  ;;  %s799_s2 = sshll.u32 %s1261_s0, 4  ;;  %s801_s5 = sshll.u32 %s1403_s3, 4  ;;  %s800_s2 = int_to_ptr.vmem [resolvable:$true] %s799_s2  ;;  %s802_s5 = int_to_ptr.hbm [resolvable:$true] %s801_s5 }
  0x25   :  { %258 = vmatpush.bf16.msra.mxu0 %v847_v4  ;;  %v1111_v38 = vld [vmem:[#allocation7 + $0x38] sm:$0xff]  ;;  %v1117_v1 = vld [vmem:[#allocation7 + $0x68] sm:$0xff]  ;;  %v1126_v8 = vld [vmem:[#allocation7 + $0xb0] sm:$0xff] }
  0x26   :  { %271 = vmatpush.bf16.msra.mxu1 %v851_v5  ;;  %v1119_v39 = vld [vmem:[#allocation7 + $0x78] sm:$0xff]  ;;  %v1134_v11 = vld [vmem:[#allocation7 + $0xf0] sm:$0xff] }
  0x27   :  { %284 = vmatpush.bf16.msra.mxu2 %v855_v6  ;;  %297 = vmatpush.bf16.msra.mxu3 %v859_v10  ;;  %v1127_v58 = vld [vmem:[#allocation7 + $0xb8] sm:$0xff] }
  0x28   :  { %v1135_v63 = vld [vmem:[#allocation7 + $0xf8] sm:$0xff] }
  0x29   :  { %259 = vmatpush.bf16.msra.mxu0 %v831_v16 }
  0x2a   :  { %272 = vmatpush.bf16.msra.mxu1 %v835_v17  ;;  %v1108_v17 = vld [vmem:[#allocation7 + $0x20] sm:$0xff] }
  0x2b   :  { %285 = vmatpush.bf16.msra.mxu2 %v839_v18  ;;  %298 = vmatpush.bf16.msra.mxu3 %v843_v22  ;;  %v1116_v18 = vld [vmem:[#allocation7 + $0x60] sm:$0xff] }
  0x2d   :  { %260 = vmatpush.bf16.msra.mxu0 %v815_v28 }
  0x2e   :  { %273 = vmatpush.bf16.msra.mxu1 %v819_v29 }
  0x2f   :  { %286 = vmatpush.bf16.msra.mxu2 %v823_v30  ;;  %299 = vmatpush.bf16.msra.mxu3 %v827_v31 }
  0x30   :  { %261 = vmatmul.bf16.vlgmr.msra.gmra.mxu0 %v60_v32 }
  0x31   :  { %274 = vmatmul.bf16.vlgmr.msra.gmra.mxu1 %v60_v32  ;;  %741 = vmatpush.bf16.msrb.mxu0 %v1111_v38  ;;  %v1107_v38 = vld [vmem:[#allocation7 + $0x18] sm:$0xff] }
  0x32   :  { %287 = vmatmul.bf16.vlgmr.msra.gmra.mxu2 %v60_v32  ;;  %300 = vmatmul.bf16.vlgmr.msra.gmra.mxu3 %v60_v32  ;;  %v1125_v32 = vld [vmem:[#allocation7 + $0xa8] sm:$0xff] }
  0x33   :  { %754 = vmatpush.bf16.msrb.mxu1 %v1119_v39  ;;  %767 = vmatpush.bf16.msrb.mxu2 %v1127_v58  ;;  %v1106_v58 = vld [vmem:[#allocation7 + $0x10] sm:$0xff] }
  0x34   :  { %780 = vmatpush.bf16.msrb.mxu3 %v1135_v63 }
  0x35   :  { %742 = vmatpush.bf16.msrb.mxu0 %v1110_v46  ;;  %v1115_v46 = vld [vmem:[#allocation7 + $0x58] sm:$0xff] }
  0x37   :  { %755 = vmatpush.bf16.msrb.mxu1 %v1118_v47  ;;  %768 = vmatpush.bf16.msrb.mxu2 %v1126_v8 }
  0x38   :  { %781 = vmatpush.bf16.msrb.mxu3 %v1134_v11  ;;  %v1113_v11 = vld [vmem:[#allocation7 + $0x48] sm:$0xff] }
  0x39   :  { %743 = vmatpush.bf16.msrb.mxu0 %v1109_v0  ;;  %v1114_v0 = vld [vmem:[#allocation7 + $0x50] sm:$0xff] }
  0x3b   :  { %756 = vmatpush.bf16.msrb.mxu1 %v1117_v1  ;;  %769 = vmatpush.bf16.msrb.mxu2 %v1125_v32 }
  0x3d   :  { %744 = vmatpush.bf16.msrb.mxu0 %v1108_v17 }
  0x3f   :  { %757 = vmatpush.bf16.msrb.mxu1 %v1116_v18 }
  0x41   :  { %745 = vmatpush.bf16.msrb.mxu0 %v1107_v38 }
  0x43   :  { %758 = vmatpush.bf16.msrb.mxu1 %v1115_v46 }
  0x45   :  { %746 = vmatpush.bf16.msrb.mxu0 %v1106_v58 }
  0x47   :  { %759 = vmatpush.bf16.msrb.mxu1 %v1114_v0 }
  0x4b   :  { %760 = vmatpush.bf16.msrb.mxu1 %v1113_v11 }
  0xad   :  { %v1291_v33 = vpop.f32.mrf.mxu0 }
  0xae   :  { %v1294_v34 = vmul.f32 0.70710677, %v1291_v33  ;;  %v1296_v35 = vpop.f32.mrf.mxu1 }
  0xaf   :  { %v1299_v36 = vmul.f32 0.70710677, %v1296_v35 }
  0xb0   :  { %v313_v37 = vmul.f32 %v1294_v34, %v1294_v34 }
  0xb1   :  { %v353_v40 = vmul.f32 %v1299_v36, %v1299_v36 }
  0xb2   :  { %v1305_v41 = vmin.f32 %v313_v37, 16.0  ;;  %v1133_v37 = vld [vmem:[#allocation7 + $0xe8] sm:$0xff] }
  0xb3   :  { %v1307_v42 = vmin.f32 %v353_v40, 16.0  ;;  %782 = vmatpush.bf16.msrb.mxu3 %v1133_v37 }
  0xb4   :  { %v315_v43 = vmul.f32 2.1237322e-06, %v1305_v41  ;;  %v326_v44 = vmul.f32 3.8918573e-05, %v1305_v41 }
  0xb5   :  { %v1311_v45 = vpop.f32.mrf.mxu2  ;;  %v355_v48 = vmul.f32 2.1237322e-06, %v1307_v42  ;;  %v366_v49 = vmul.f32 3.8918573e-05, %v1307_v42  ;;  %v1315_v50 = vpop.f32.mrf.mxu3 }
  0xb6   :  { %v264_v51 = vpop.f32.mrf.mxu0  ;;  %v316_v52 = vadd.f32 0.00028619796, %v315_v43  ;;  %v327_v53 = vadd.f32 0.001143296, %v326_v44  ;;  %v1318_v54 = vmul.f32 0.70710677, %v1311_v45  ;;  %v277_v55 = vpop.f32.mrf.mxu1 }
  0xb7   :  { %v356_v56 = vadd.f32 0.00028619796, %v355_v48  ;;  %v367_v57 = vadd.f32 0.001143296, %v366_v49  ;;  %v1325_v62 = vmul.f32 0.70710677, %v1315_v50 }
  0xb8   :  { %v317_v59 = vmul.f32 %v316_v52, %v1305_v41  ;;  %v328_v60 = vmul.f32 %v327_v53, %v1305_v41  ;;  %v393_v61 = vmul.f32 %v1318_v54, %v1318_v54 }
  0xb9   :  { %v357_v2 = vmul.f32 %v356_v56, %v1307_v42  ;;  %v368_v3 = vmul.f32 %v367_v57, %v1307_v42  ;;  %v433_v7 = vmul.f32 %v1325_v62, %v1325_v62  ;;  %v1124_v56 = vld [vmem:[#allocation7 + $0xa0] sm:$0xff] }
  0xba   :  { %v318_v4 = vadd.f32 0.0036580483, %v317_v59  ;;  %v329_v5 = vadd.f32 0.014752088, %v328_v60  ;;  %v1329_v6 = vmin.f32 %v393_v61, 16.0  ;;  %v1132_v57 = vld [vmem:[#allocation7 + $0xe0] sm:$0xff]  ;;  %770 = vmatpush.bf16.msrb.mxu2 %v1124_v56 }
  0xbb   :  { %v358_v9 = vadd.f32 0.0036580483, %v357_v2  ;;  %v369_v10 = vadd.f32 0.014752088, %v368_v3  ;;  %v1339_v21 = vmin.f32 %v433_v7, 16.0  ;;  %783 = vmatpush.bf16.msrb.mxu3 %v1132_v57  ;;  %v1123_v2 = vld [vmem:[#allocation7 + $0x98] sm:$0xff] }
  0xbc   :  { %v319_v12 = vmul.f32 %v318_v4, %v1305_v41  ;;  %v330_v13 = vmul.f32 %v329_v5, %v1305_v41  ;;  %v395_v14 = vmul.f32 2.1237322e-06, %v1329_v6  ;;  %v406_v15 = vmul.f32 3.8918573e-05, %v1329_v6  ;;  %v1131_v7 = vld [vmem:[#allocation7 + $0xd8] sm:$0xff] }
  0xbd   :  { %v290_v16 = vpop.f32.mrf.mxu2  ;;  %v359_v19 = vmul.f32 %v358_v9, %v1307_v42  ;;  %v370_v20 = vmul.f32 %v369_v10, %v1307_v42  ;;  %v303_v22 = vpop.f32.mrf.mxu3  ;;  %v435_v43 = vmul.f32 2.1237322e-06, %v1339_v21  ;;  %v446_v44 = vmul.f32 3.8918573e-05, %v1339_v21  ;;  %v1105_v10 = vld [vmem:[#allocation7 + $0x8] sm:$0xff] }
  0xbe   :  { %v320_v23 = vadd.f32 0.05243302, %v319_v12  ;;  %v331_v24 = vadd.f32 0.112945676, %v330_v13  ;;  %v396_v25 = vadd.f32 0.00028619796, %v395_v14  ;;  %771 = vmatpush.bf16.msrb.mxu2 %v1123_v2  ;;  %747 = vmatpush.bf16.msrb.mxu0 %v1105_v10 }
  0xbf   :  { %v371_v26 = vadd.f32 0.112945676, %v370_v20  ;;  %v407_v27 = vadd.f32 0.001143296, %v406_v15  ;;  %v360_v30 = vadd.f32 0.05243302, %v359_v19  ;;  %784 = vmatpush.bf16.msrb.mxu3 %v1131_v7 }
  0xc0   :  { %v321_v28 = vmul.f32 %v320_v23, %v1305_v41  ;;  %v332_v29 = vmul.f32 %v331_v24, %v1305_v41  ;;  %v397_v31 = vmul.f32 %v396_v25, %v1329_v6  ;;  %v436_v61 = vadd.f32 0.00028619796, %v435_v43  ;;  %v1122_v14 = vld [vmem:[#allocation7 + $0x90] sm:$0xff]  ;;  %v1104_v19 = vld [vmem:[#allocation7] sm:$0xff] }
  0xc1   :  { %v372_v39 = vmul.f32 %v371_v26, %v1307_v42  ;;  %v408_v40 = vmul.f32 %v407_v27, %v1329_v6  ;;  %v361_v53 = vmul.f32 %v360_v30, %v1307_v42  ;;  %v447_v63 = vadd.f32 0.001143296, %v446_v44  ;;  %v1130_v15 = vld [vmem:[#allocation7 + $0xd0] sm:$0xff]  ;;  %v1112_v20 = vld [vmem:[#allocation7 + $0x40] sm:$0xff]  ;;  %v1121_v27 = vld [vmem:[#allocation7 + $0x88] sm:$0xff] }
  0xc2   :  { %v333_v47 = vadd.f32 0.4994258, %v332_v29  ;;  %v322_v48 = vadd.f32 0.18741608, %v321_v28  ;;  %v398_v55 = vadd.f32 0.0036580483, %v397_v31  ;;  %v437_v13 = vmul.f32 %v436_v61, %v1339_v21  ;;  %772 = vmatpush.bf16.msrb.mxu2 %v1122_v14  ;;  %748 = vmatpush.bf16.msrb.mxu0 %v1104_v19 }
  0xc3   :  { %v373_v49 = vadd.f32 0.4994258, %v372_v39  ;;  %v409_v51 = vadd.f32 0.014752088, %v408_v40  ;;  %v448_v5 = vmul.f32 %v447_v63, %v1339_v21  ;;  %v362_v9 = vadd.f32 0.18741608, %v361_v53  ;;  %785 = vmatpush.bf16.msrb.mxu3 %v1130_v15  ;;  %761 = vmatpush.bf16.msrb.mxu1 %v1112_v20 }
  0xc4   :  { %v334_v52 = vmul.f32 %v333_v47, %v1305_v41  ;;  %v323_v8 = vmul.f32 %v322_v48, %v1305_v41  ;;  %v399_v12 = vmul.f32 %v398_v55, %v1329_v6  ;;  %v438_v24 = vadd.f32 0.0036580483, %v437_v13  ;;  %v1129_v28 = vld [vmem:[#allocation7 + $0xc8] sm:$0xff] }
  0xc5   :  { %v374_v59 = vmul.f32 %v373_v49, %v1307_v42  ;;  %v410_v60 = vmul.f32 %v409_v51, %v1329_v6  ;;  %v449_v17 = vadd.f32 0.014752088, %v448_v5  ;;  %v363_v18 = vmul.f32 %v362_v9, %v1307_v42  ;;  %v1128_v51 = vld [vmem:[#allocation7 + $0xc0] sm:$0xff] }
  0xc6   :  { %v1352_v1 = vadd.f32 1.0, %v334_v52  ;;  %v324_v41 = vadd.f32 1.1283791, %v323_v8  ;;  %v400_v22 = vadd.f32 0.05243302, %v399_v12  ;;  %v439_v44 = vmul.f32 %v438_v24, %v1339_v21  ;;  %773 = vmatpush.bf16.msrb.mxu2 %v1121_v27 }
  0xc7   :  { %v1354_v3 = vadd.f32 1.0, %v374_v59  ;;  %v411_v4 = vadd.f32 0.112945676, %v410_v60  ;;  %v450_v25 = vmul.f32 %v449_v17, %v1339_v21  ;;  %v364_v32 = vadd.f32 1.1283791, %v363_v18  ;;  %786 = vmatpush.bf16.msrb.mxu3 %v1129_v28 }
  0xc8   :  { %1144 = vrcp.f32 %v1352_v1  ;;  %v325_v42 = vmul.f32 %v324_v41, %v1294_v34  ;;  %v401_v40 = vmul.f32 %v400_v22, %v1329_v6  ;;  %v345_v46 = vand.u32 2147483647, %v1352_v1  ;;  %v1120_v34 = vld [vmem:[#allocation7 + $0x80] sm:$0xff] }
  0xc9   :  { %1146 = vrcp.f32 %v1354_v3  ;;  %v412_v16 = vmul.f32 %v411_v4, %v1329_v6  ;;  %v451_v38 = vadd.f32 0.112945676, %v450_v25  ;;  %v347_v47 = vand.u32 2147483648, %v1352_v1 }
  0xca   :  { %v387_v53 = vand.u32 2147483648, %v1354_v3  ;;  %v385_v56 = vand.u32 2147483647, %v1354_v3  ;;  %vm341_vm2 = vweird.f32 %v1352_v1  ;;  %v402_v59 = vadd.f32 0.18741608, %v401_v40  ;;  %774 = vmatpush.bf16.msrb.mxu2 %v1120_v34 }
  0xcb   :  { %v413_v23 = vadd.f32 0.4994258, %v412_v16  ;;  %v452_v49 = vmul.f32 %v451_v38, %v1339_v21  ;;  %v440_v60 = vadd.f32 0.05243302, %v439_v44  ;;  %v348_v61 = vor.u32 1.1754944e-38, %v347_v47  ;;  %787 = vmatpush.bf16.msrb.mxu3 %v1128_v51 }
  0xcc   :  { %vm381_vm4 = vweird.f32 %v1354_v3  ;;  %vm346_vm5 = vcmp.eq.f32.partialorder %v345_v46, 8.507059e+37  ;;  %v365_v4 = vmul.f32 %v364_v32, %v1299_v36  ;;  %v388_v5 = vor.u32 1.1754944e-38, %v387_v53 }
  0xcd   :  { %v414_v31 = vmul.f32 %v413_v23, %v1329_v6  ;;  %v453_v57 = vadd.f32 0.4994258, %v452_v49  ;;  %vm386_vm7 = vcmp.eq.f32.partialorder %v385_v56, 8.507059e+37  ;;  %v441_v12 = vmul.f32 %v440_v60, %v1339_v21 }
  0xce   :  { %v1145_v26 = vpop.eup %1144  ;;  %v305_v36 = vmul.f32 0.5, %v1291_v33  ;;  %v306_v16 = vmul.f32 0.5, %v1296_v35  ;;  %v307_v47 = vmul.f32 0.5, %v1311_v45 }
  0xcf   :  { %v1147_v29 = vpop.eup %1146  ;;  %v337_v30 = vmul.f32 %v1145_v26, %v1352_v1  ;;  %v1370_v43 = vadd.f32 1.0, %v414_v31  ;;  %vm342_vm0 = vweird.f32 %v1145_v26  ;;  %v454_v0 = vmul.f32 %v453_v57, %v1339_v21 }
  0xd0   :  { %v377_v37 = vmul.f32 %v1147_v29, %v1354_v3  ;;  %vm382_vm1 = vweird.f32 %v1147_v29  ;;  %vm343_vm3 = vmor %vm341_vm2, %vm342_vm0  ;;  %v403_v3 = vmul.f32 %v402_v59, %v1329_v6  ;;  %v442_v22 = vadd.f32 0.18741608, %v441_v12 }
  0xd1   :  { %v338_v39 = vsub.f32 1.0, %v337_v30  ;;  %1148 = vrcp.f32 %v1370_v43  ;;  %vm383_vm6 = vmor %vm381_vm4, %vm382_vm1  ;;  %v455_v8 = vadd.f32 1.0, %v454_v0  ;;  %v427_v20 = vand.u32 2147483648, %v1370_v43 }
  0xd2   :  { %v378_v48 = vsub.f32 1.0, %v377_v37  ;;  %v404_v19 = vadd.f32 1.1283791, %v403_v3  ;;  %v425_v24 = vand.u32 2147483647, %v1370_v43  ;;  %vm421_vm9 = vweird.f32 %v1370_v43 }
  0xd3   :  { %v339_v52 = vmul.f32 %v1145_v26, %v338_v39  ;;  %1150 = vrcp.f32 %v455_v8  ;;  %v428_v28 = vor.u32 1.1754944e-38, %v427_v20  ;;  %v467_v44 = vand.u32 2147483648, %v455_v8 }
  0xd4   :  { %v379_v55 = vmul.f32 %v1147_v29, %v378_v48  ;;  %v405_v35 = vmul.f32 %v404_v19, %v1318_v54  ;;  %vm426_vm11 = vcmp.eq.f32.partialorder %v425_v24, 8.507059e+37  ;;  %v465_v54 = vand.u32 2147483647, %v455_v8 }
  0xd5   :  { %v340_v58 = vadd.f32 %v1145_v26, %v339_v52  ;;  %vm461_vm13 = vweird.f32 %v455_v8  ;;  %v468_v49 = vor.u32 1.1754944e-38, %v467_v44 }
  0xd6   :  { %v380_v63 = vadd.f32 %v1147_v29, %v379_v55  ;;  %vm466_vm15 = vcmp.eq.f32.partialorder %v465_v54, 8.507059e+37 }
  0xd7   :  { %v344_v2 = vsel %vm343_vm3, %v1145_v26, %v340_v58  ;;  %v1149_v9 = vpop.eup %1148  ;;  %v308_v58 = vmul.f32 0.5, %v1315_v50 }
  0xd8   :  { %v349_v7 = vsel %vm346_vm5, %v348_v61, %v344_v2  ;;  %v384_v1 = vsel %vm383_vm6, %v1147_v29, %v380_v63  ;;  %v417_v14 = vmul.f32 %v1149_v9, %v1370_v43  ;;  %vm422_vm8 = vweird.f32 %v1149_v9 }
  0xd9   :  { %v350_v10 = vmul.f32 %v349_v7, %v325_v42  ;;  %v389_v11 = vsel %vm386_vm7, %v388_v5, %v384_v1  ;;  %v1151_v33 = vpop.eup %1150  ;;  %vm423_vm10 = vmor %vm421_vm9, %vm422_vm8  ;;  %v443_v29 = vmul.f32 %v442_v22, %v1339_v21 }
  0xda   :  { %v390_v13 = vmul.f32 %v389_v11, %v365_v4  ;;  %v418_v41 = vsub.f32 1.0, %v417_v14  ;;  %v457_v42 = vmul.f32 %v1151_v33, %v455_v8  ;;  %vm462_vm12 = vweird.f32 %v1151_v33 }
  0xdb   :  { %v940_v15 = vclamps-f32 %v350_v10, 1.0  ;;  %v444_v40 = vadd.f32 1.1283791, %v443_v29  ;;  %vm463_vm14 = vmor %vm461_vm13, %vm462_vm12 }
  0xdc   :  { %v941_v17 = vclamps-f32 %v390_v13, 1.0  ;;  %v419_v6 = vmul.f32 %v1149_v9, %v418_v41  ;;  %v458_v39 = vsub.f32 1.0, %v457_v42 }
  0xdd   :  { %v473_v18 = vadd.f32 1.0, %v940_v15  ;;  %v445_v51 = vmul.f32 %v444_v40, %v1325_v62 }
  0xde   :  { %v474_v23 = vadd.f32 1.0, %v941_v17  ;;  %v420_v27 = vadd.f32 %v1149_v9, %v419_v6  ;;  %v459_v46 = vmul.f32 %v1151_v33, %v458_v39 }
  0xdf   :  { %v477_v25 = vmul.f32 %v473_v18, %v305_v36 }
  0xe0   :  { %v478_v26 = vmul.f32 %v474_v23, %v306_v16  ;;  %v424_v31 = vsel %vm423_vm10, %v1149_v9, %v420_v27  ;;  %v460_v21 = vadd.f32 %v1151_v33, %v459_v46 }
  0xe1   :  { %v481_v30 = vpack.c.bf16 %v477_v25, %v477_v25  ;;  %v429_v37 = vsel %vm426_vm11, %v428_v28, %v424_v31 }
  0xe2   :  { %v482_v32 = vpack.c.bf16 %v478_v26, %v478_v26  ;;  %v430_v38 = vmul.f32 %v429_v37, %v405_v35  ;;  %v464_v52 = vsel %vm463_vm14, %v1151_v33, %v460_v21 }
  0xe3   :  { %749 = vmatmul.bf16.vlgmr.msrb.gmra.mxu0 %v481_v30  ;;  %v469_v53 = vsel %vm466_vm15, %v468_v49, %v464_v52 }
  0xe4   :  { %762 = vmatmul.bf16.vlgmr.msrb.gmra.mxu1 %v482_v32  ;;  %v942_v43 = vclamps-f32 %v430_v38, 1.0  ;;  %v470_v55 = vmul.f32 %v469_v53, %v445_v51 }
  0xe6   :  { %v475_v48 = vadd.f32 1.0, %v942_v43  ;;  %v943_v57 = vclamps-f32 %v470_v55, 1.0 }
  0xe8   :  { %v479_v34 = vmul.f32 %v475_v48, %v307_v47  ;;  %v476_v59 = vadd.f32 1.0, %v943_v57 }
  0xea   :  { %v483_v56 = vpack.c.bf16 %v479_v34, %v479_v34  ;;  %v480_v60 = vmul.f32 %v476_v59, %v308_v58 }
  0xec   :  { %775 = vmatmul.bf16.vlgmr.msrb.gmra.mxu2 %v483_v56  ;;  %v484_v45 = vpack.c.bf16 %v480_v60, %v480_v60 }
  0xee   :  { %788 = vmatmul.bf16.vlgmr.msrb.gmra.mxu3 %v484_v45 }
 0x160   :  { %v750_v61 = vpop.f32.mrf.mxu0 }
 0x161   :  { %v763_v63 = vpop.f32.mrf.mxu1 }
 0x162   :  { %v764_v5 = vadd.f32 %v763_v63, %v750_v61 }
 0x168   :  { %v752_v0 = vpop.f32.mrf.mxu0 }
 0x169   :  { %v765_v2 = vpop.f32.mrf.mxu1 }
 0x16f   :  { %v776_v4 = vpop.f32.mrf.mxu2 }
 0x170   :  { %v777_v62 = vadd.f32 %v776_v4, %v764_v5 }
 0x171   :  { %v789_v7 = vpop.f32.mrf.mxu3 }
 0x172   :  { %v790_v50 = vadd.f32 %v789_v7, %v777_v62 }
 0x174   :  { %793 = vst [vmem:[#allocation8] sm:$0xff] %v790_v50 }
 0x175   :  { %804 = dma.vmem_to_hbm [thread:$0]  %s800_s2, 128, %s802_s5, [#allocation4]  }
 0x177   :  { %v778_v1 = vpop.f32.mrf.mxu2 }
 0x179   :  { %v791_v8 = vpop.f32.mrf.mxu3 }
 0x17a   :  { %1252 = dma.done.wait [#allocation4], 128  }
 0x17b   :  { %1253 = vsyncadd [#allocation4], 4294967168 }
 0x17c   :  { %809 = vsyncpa [#allocation3], 1 }
 0x17d   :  { %810 = vsyncpa [#allocation6], 1 }
 0x17e   :  { %811 = vsyncpa [#allocation4], 1 }

</bundles_post_ra>
